<compile_context>
chip_gen: v7x
topology: tpu7x:2x2x1
jax: 0.10.0
libtpu: 0.0.40
codegen_flags: <defaults>
</compile_context>

<pallas_src>
import functools
import math

import jax
import jax.numpy as jnp
from jax.experimental import pallas as pl
from jax.experimental.pallas import tpu as pltpu

LANE = 128        # pad every output-feature dim to a multiple of this
ROW_TILE = 512    # row tile when the flattened batch of rows is large


def _round_up(n, m):
    return ((n + m - 1) // m) * m


# ------------------------------ fused MLP kernel -----------------------------

def _mlp_kernel(x_ref, *refs, num_layers):
    """refs = (w1, b1, w2, b2, ..., wn, bn, o_ref).
    h = relu(h @ w_i + b_i) for i < n-1, h @ w_n + b_n for the last layer.
    Everything stays in VMEM/vregs; one MXU pass per layer."""
    o_ref = refs[-1]
    h = x_ref[...]
    for i in range(num_layers):
        w = refs[2 * i][...]
        b = refs[2 * i + 1][...]
        h = jnp.dot(h, w, preferred_element_type=jnp.float32) + b
        if i < num_layers - 1:
            h = jnp.maximum(h, 0.0)
    o_ref[...] = h


# ------------------------------ parameter prep -------------------------------

def init_mlp_params(key, input_dim, hidden_dim, output_dim, num_layers):
    """nn.Linear-style init, then a ONE-TIME pre-transpose to (K, N) with
    zero-padding of N up to a multiple of 128 (lane-dense).  The first layer's
    K stays at input_dim so x needs no wrapper-side padding; subsequent layers'
    K equals the previous layer's padded N (the padded activation columns are
    exactly zero, so results are unchanged)."""
    dims = [input_dim] + [hidden_dim] * (num_layers - 1) + [output_dim]
    layer_keys = jax.random.split(key, num_layers)
    params = []
    k_prev = input_dim                      # K of layer 0 = raw input_dim
    for i in range(num_layers):
        n_in, n_out = dims[i], dims[i + 1]
        kw, kb = jax.random.split(layer_keys[i])
        bound = 1.0 / math.sqrt(n_in)
        w = jax.random.uniform(kw, (n_out, n_in), jnp.float32, -bound, bound)
        b = jax.random.uniform(kb, (n_out,), jnp.float32, -bound, bound)
        np_ = _round_up(n_out, LANE)
        wt = jnp.zeros((k_prev, np_), jnp.float32).at[:n_in, :n_out].set(w.T)
        bp = jnp.zeros((1, np_), jnp.float32).at[0, :n_out].set(b)
        params.append((wt, bp))
        k_prev = np_                        # next layer consumes padded width
    return params


# --------------------------------- forward -----------------------------------

def mlp_forward(x, params, *, output_dim):
    """x: (..., input_dim).  Returns (..., output_dim)."""
    num_layers = len(params)
    lead = x.shape[:-1]
    k_in = x.shape[-1]
    np_out = params[-1][0].shape[1]         # padded output feature dim

    rows = 1
    for d in lead:
        rows *= d
    x2 = x.reshape(rows, k_in)
    if x2.dtype != jnp.float32:
        x2 = x2.astype(jnp.float32)

    # Row tiling: single block for small inputs; parallel row grid for large
    # inputs (shards across both v7x TensorCores; harmless on v5e/v6e).
    # Non-divisible row counts use Pallas edge-block semantics (no padding
    # copies): OOB reads are undefined but only feed OOB output rows, and OOB
    # writes are dropped.
    if rows <= ROW_TILE:
        tile_m, grid_m = rows, 1
    else:
        tile_m, grid_m = ROW_TILE, pl.cdiv(rows, ROW_TILE)

    flat_wb = []
    in_specs = [pl.BlockSpec((tile_m, k_in), lambda i: (i, 0))]
    for (w, b) in params:
        flat_wb += [w, b]
        in_specs += [pl.BlockSpec(w.shape, lambda i: (0, 0)),
                     pl.BlockSpec(b.shape, lambda i: (0, 0))]

    out = pl.pallas_call(
        functools.partial(_mlp_kernel, num_layers=num_layers),
        out_shape=jax.ShapeDtypeStruct((rows, np_out), jnp.float32),
        grid=(grid_m,),
        in_specs=in_specs,
        out_specs=pl.BlockSpec((tile_m, np_out), lambda i: (i, 0)),
        compiler_params=pltpu.CompilerParams(
            dimension_semantics=("parallel",)),
    )(x2, *flat_wb)

    out = out[:, :output_dim]
    return out.reshape(lead + (output_dim,))


# ------------------------------------ main ------------------------------------

if __name__ == "__main__":
    key = jax.random.PRNGKey(0)
    k_x, k_p, k_x2 = jax.random.split(key, 3)

    # DETR bbox head: MLP(hidden_dim, hidden_dim, 4, 3) at small width
    INPUT_DIM, HIDDEN_DIM, OUTPUT_DIM, NUM_LAYERS = 32, 32, 4, 3
    B, Q = 2, 8

    params = init_mlp_params(k_p, INPUT_DIM, HIDDEN_DIM, OUTPUT_DIM, NUM_LAYERS)
    x = jax.random.normal(k_x, (B, Q, INPUT_DIM), jnp.float32)

    fwd = jax.jit(functools.partial(mlp_forward, output_dim=OUTPUT_DIM))
    out = fwd(x, params)
    jax.block_until_ready(out)
    assert out.shape == (B, Q, OUTPUT_DIM), out.shape
    assert bool(jnp.all(jnp.isfinite(out)))

    # pure-JAX reference (mathematically identical: padded columns are zeros,
    # first layer's K is the raw input_dim so x feeds in directly)
    def ref_mlp(xx):
        h = xx.reshape(-1, INPUT_DIM).astype(jnp.float32)
        for i, (w, b) in enumerate(params):
            h = h @ w + b[0]
            if i < NUM_LAYERS - 1:
                h = jnp.maximum(h, 0.0)
        return h[:, :OUTPUT_DIM].reshape(xx.shape[:-1] + (OUTPUT_DIM,))

    assert bool(jnp.allclose(out, ref_mlp(x), atol=1e-4, rtol=1e-4))

    # larger input: 640 rows -> row grid of 2 (one full 512-row tile + a ragged
    # final tile), exercising the "parallel" grid and edge-block handling.
    x_big = jax.random.normal(k_x2, (2, 16, 20, INPUT_DIM), jnp.float32)
    out_big = fwd(x_big, params)
    jax.block_until_ready(out_big)
    assert out_big.shape == (2, 16, 20, OUTPUT_DIM), out_big.shape
    assert bool(jnp.allclose(out_big, ref_mlp(x_big), atol=1e-4, rtol=1e-4))

    print("KERNEL_OK")
</pallas_src>

<mosaic_0001>
module attributes {stable_mosaic.version = 11 : i64} {
  func.func @_mlp_kernel(%arg0: i32, %arg1: memref<16x32xf32, #tpu.memory_space<vmem>>, %arg2: memref<32x128xf32, #tpu.memory_space<vmem>>, %arg3: memref<1x128xf32, #tpu.memory_space<vmem>>, %arg4: memref<128x128xf32, #tpu.memory_space<vmem>>, %arg5: memref<1x128xf32, #tpu.memory_space<vmem>>, %arg6: memref<128x128xf32, #tpu.memory_space<vmem>>, %arg7: memref<1x128xf32, #tpu.memory_space<vmem>>, %arg8: memref<16x128xf32, #tpu.memory_space<vmem>>) attributes {dimension_semantics = [#tpu.dimension_semantics<parallel>], iteration_bounds = array<i64: 1>, scalar_prefetch = 0 : i64, scratch_operands = 0 : i64, tpu.core_type = #tpu.core_type<tc>, window_params = [{transform_indices = @transform_0, window_bounds = array<i64: 16, 32>}, {pipeline_mode = #tpu.pipeline_mode<synchronous>, transform_indices = @transform_1, window_bounds = array<i64: 32, 128>}, {pipeline_mode = #tpu.pipeline_mode<synchronous>, transform_indices = @transform_2, window_bounds = array<i64: 1, 128>}, {pipeline_mode = #tpu.pipeline_mode<synchronous>, transform_indices = @transform_3, window_bounds = array<i64: 128, 128>}, {pipeline_mode = #tpu.pipeline_mode<synchronous>, transform_indices = @transform_4, window_bounds = array<i64: 1, 128>}, {pipeline_mode = #tpu.pipeline_mode<synchronous>, transform_indices = @transform_5, window_bounds = array<i64: 128, 128>}, {pipeline_mode = #tpu.pipeline_mode<synchronous>, transform_indices = @transform_6, window_bounds = array<i64: 1, 128>}, {transform_indices = @transform_7, window_bounds = array<i64: 16, 128>}]} {
    %c0 = arith.constant 0 : index
    %c0_0 = arith.constant 0 : index
    %0 = vector.load %arg1[%c0, %c0_0] : memref<16x32xf32, #tpu.memory_space<vmem>>, vector<16x32xf32>
    %c0_1 = arith.constant 0 : index
    %c0_2 = arith.constant 0 : index
    %1 = vector.load %arg2[%c0_1, %c0_2] : memref<32x128xf32, #tpu.memory_space<vmem>>, vector<32x128xf32>
    %c0_3 = arith.constant 0 : index
    %c0_4 = arith.constant 0 : index
    %2 = vector.load %arg3[%c0_3, %c0_4] : memref<1x128xf32, #tpu.memory_space<vmem>>, vector<1x128xf32>
    %cst = arith.constant dense<0.000000e+00> : vector<16x128xf32>
    %3 = tpu.matmul %0, %1, %cst {dimension_numbers = #tpu.dot_dimension_numbers<[1], [0], [0], [1], [0, 0, 1, 1], [], []>} : vector<16x32xf32>, vector<32x128xf32>, vector<16x128xf32> -> vector<16x128xf32>
    %4 = vector.broadcast %2 : vector<1x128xf32> to vector<16x128xf32>
    %5 = arith.addf %3, %4 : vector<16x128xf32>
    %cst_5 = arith.constant 0.000000e+00 : f32
    %6 = vector.broadcast %cst_5 : f32 to vector<16x128xf32>
    %7 = arith.maximumf %5, %6 : vector<16x128xf32>
    %c0_6 = arith.constant 0 : index
    %c0_7 = arith.constant 0 : index
    %8 = vector.load %arg4[%c0_6, %c0_7] : memref<128x128xf32, #tpu.memory_space<vmem>>, vector<128x128xf32>
    %c0_8 = arith.constant 0 : index
    %c0_9 = arith.constant 0 : index
    %9 = vector.load %arg5[%c0_8, %c0_9] : memref<1x128xf32, #tpu.memory_space<vmem>>, vector<1x128xf32>
    %cst_10 = arith.constant dense<0.000000e+00> : vector<16x128xf32>
    %10 = tpu.matmul %7, %8, %cst_10 {dimension_numbers = #tpu.dot_dimension_numbers<[1], [0], [0], [1], [0, 0, 1, 1], [], []>} : vector<16x128xf32>, vector<128x128xf32>, vector<16x128xf32> -> vector<16x128xf32>
    %11 = vector.broadcast %9 : vector<1x128xf32> to vector<16x128xf32>
    %12 = arith.addf %10, %11 : vector<16x128xf32>
    %cst_11 = arith.constant 0.000000e+00 : f32
    %13 = vector.broadcast %cst_11 : f32 to vector<16x128xf32>
    %14 = arith.maximumf %12, %13 : vector<16x128xf32>
    %c0_12 = arith.constant 0 : index
    %c0_13 = arith.constant 0 : index
    %15 = vector.load %arg6[%c0_12, %c0_13] : memref<128x128xf32, #tpu.memory_space<vmem>>, vector<128x128xf32>
    %c0_14 = arith.constant 0 : index
    %c0_15 = arith.constant 0 : index
    %16 = vector.load %arg7[%c0_14, %c0_15] : memref<1x128xf32, #tpu.memory_space<vmem>>, vector<1x128xf32>
    %cst_16 = arith.constant dense<0.000000e+00> : vector<16x128xf32>
    %17 = tpu.matmul %14, %15, %cst_16 {dimension_numbers = #tpu.dot_dimension_numbers<[1], [0], [0], [1], [0, 0, 1, 1], [], []>} : vector<16x128xf32>, vector<128x128xf32>, vector<16x128xf32> -> vector<16x128xf32>
    %18 = vector.broadcast %16 : vector<1x128xf32> to vector<16x128xf32>
    %19 = arith.addf %17, %18 : vector<16x128xf32>
    %c0_17 = arith.constant 0 : index
    %c0_18 = arith.constant 0 : index
    %20 = vector.load %arg8[%c0_17, %c0_18] : memref<16x128xf32, #tpu.memory_space<vmem>>, vector<16x128xf32>
    tpu.vector_store %arg8[%c0_17, %c0_18], %19 {strides = array<i32>} : memref<16x128xf32, #tpu.memory_space<vmem>>, vector<16x128xf32>,
    return
  }
  func.func @transform_0(%arg0: i32) -> (i32, i32) {
    %c0_i32 = arith.constant 0 : i32
    %c0_i32_0 = arith.constant 0 : i32
    return %arg0, %c0_i32 : i32, i32
  }
  func.func @transform_1(%arg0: i32) -> (i32, i32) {
    %c0_i32 = arith.constant 0 : i32
    %c0_i32_0 = arith.constant 0 : i32
    %c0_i32_1 = arith.constant 0 : i32
    return %c0_i32, %c0_i32_0 : i32, i32
  }
  func.func @transform_2(%arg0: i32) -> (i32, i32) {
    %c0_i32 = arith.constant 0 : i32
    %c0_i32_0 = arith.constant 0 : i32
    %c0_i32_1 = arith.constant 0 : i32
    return %c0_i32, %c0_i32_0 : i32, i32
  }
  func.func @transform_3(%arg0: i32) -> (i32, i32) {
    %c0_i32 = arith.constant 0 : i32
    %c0_i32_0 = arith.constant 0 : i32
    %c0_i32_1 = arith.constant 0 : i32
    return %c0_i32, %c0_i32_0 : i32, i32
  }
  func.func @transform_4(%arg0: i32) -> (i32, i32) {
    %c0_i32 = arith.constant 0 : i32
    %c0_i32_0 = arith.constant 0 : i32
    %c0_i32_1 = arith.constant 0 : i32
    return %c0_i32, %c0_i32_0 : i32, i32
  }
  func.func @transform_5(%arg0: i32) -> (i32, i32) {
    %c0_i32 = arith.constant 0 : i32
    %c0_i32_0 = arith.constant 0 : i32
    %c0_i32_1 = arith.constant 0 : i32
    return %c0_i32, %c0_i32_0 : i32, i32
  }
  func.func @transform_6(%arg0: i32) -> (i32, i32) {
    %c0_i32 = arith.constant 0 : i32
    %c0_i32_0 = arith.constant 0 : i32
    %c0_i32_1 = arith.constant 0 : i32
    return %c0_i32, %c0_i32_0 : i32, i32
  }
  func.func @transform_7(%arg0: i32) -> (i32, i32) {
    %c0_i32 = arith.constant 0 : i32
    %c0_i32_0 = arith.constant 0 : i32
    return %arg0, %c0_i32 : i32, i32
  }
}

</mosaic_0001>

<bundles_post_ra>
// kernel: mlp_forward.1
= control target key start
LH: loop header
LB: loop body
LE: loop exit
PB: predicated region body
PF: predicated region fallthrough
CT: control target
= control target key end

     0   :  { %12 = vsyncpa [#allocation3], 0  ;;  %s822_s0 = inlined_call_operand.hbm [shape: f32[16,32], index: 0, kind: input, shape index: {}]   ;;  %s823_s1 = inlined_call_operand.hbm [shape: f32[32,128], index: 1, kind: input, shape index: {}]   ;;  %s824_s2 = inlined_call_operand.vmem [shape: f32[1,128], index: 2, kind: input, shape index: {}]   ;;  %s825_s3 = inlined_call_operand.hbm [shape: f32[128,128], index: 3, kind: input, shape index: {}]   ;;  %s826_s4 = inlined_call_operand.vmem [shape: f32[1,128], index: 4, kind: input, shape index: {}]   ;;  %s827_s5 = inlined_call_operand.hbm [shape: f32[128,128], index: 5, kind: input, shape index: {}]   ;;  %s828_s6 = inlined_call_operand.vmem [shape: f32[1,128], index: 6, kind: input, shape index: {}]   ;;  %s829_s7 = inlined_call_operand.vmem [shape: f32[16,128], index: 7, kind: output, shape index: {}]  }
   0x1   :  { %13 = vsyncpa [#allocation5], 0 }
   0x2   :  { %14 = vsyncpa [#allocation8], 0  ;;  %s685_s24 = smov [#allocation4]   ;;  %s686_s26 = smov [#allocation2]  }
   0x3   :  { %s32_s25 = sshll.u32 %s685_s24, 4  ;;  %s20_s27 = sshll.u32 %s686_s26, 4  ;;  %s33_s25 = int_to_ptr.vmem [resolvable:$true] %s32_s25  ;;  %s731_s27 = int_to_ptr.vmem [resolvable:$true] %s20_s27 }
   0x4   :  { %s591_s30 = scalar_lea.hbm %s823_s1, 512 }
   0x5   :  { %p592_p0 = scmp.ne.s32.totalorder %s823_s1, %s591_s30  ;;  %p595_p1 = scmp.lt.u32.totalorder %s591_s30, %s823_s1 }
   0x7   :  { %p597_p2 = pnand %p595_p1, %p592_p0 }
   0x9   :  { %600 = shalt.err (!%p597_p2)
}
   0xa   :  { %s601_s12 = scalar_lea.vmem %s33_s25, 512  ;;  %p606_p4 = scmp.lt.s32.totalorder %s33_s25, %s33_s25 }
   0xb   :  { %p602_p3 = scmp.ne.s32.totalorder %s33_s25, %s601_s12  ;;  %p607_p5 = scmp.lt.s32.totalorder %s601_s12, %s601_s12 }
   0xd   :  { %p608_p6 = por %p607_p5, %p606_p4 }
   0xf   :  { %p609_p7 = pnand %p608_p6, %p602_p3 }
  0x11   :  { %612 = shalt.err (!%p609_p7)
}
  0x12   :  { %s687_s13 = smov 128   ;;  %s688_s14 = smov 8  }
  0x13   :  { %38 = dma.hbm_to_vmem [thread:$0]  %s823_s1, 512, %s33_s25, [#allocation5], %s687_s13, %s687_s13, %s688_s14  }
  0x14   :  { %s613_s19 = scalar_lea.hbm %s822_s0, 256 }
  0x15   :  { %p614_p8 = scmp.ne.s32.totalorder %s822_s0, %s613_s19  ;;  %p617_p9 = scmp.lt.u32.totalorder %s613_s19, %s822_s0 }
  0x17   :  { %p619_p10 = pnand %p617_p9, %p614_p8 }
  0x19   :  { %622 = shalt.err (!%p619_p10)
}
  0x1a   :  { %s623_s24 = scalar_lea.vmem %s731_s27, 256  ;;  %p628_p12 = scmp.lt.s32.totalorder %s731_s27, %s731_s27 }
  0x1b   :  { %p624_p11 = scmp.ne.s32.totalorder %s731_s27, %s623_s24  ;;  %p629_p13 = scmp.lt.s32.totalorder %s623_s24, %s623_s24 }
  0x1d   :  { %p630_p0 = por %p629_p13, %p628_p12 }
  0x1f   :  { %p631_p1 = pnand %p630_p0, %p624_p11 }
  0x21   :  { %634 = shalt.err (!%p631_p1)
}
  0x22   :  { %26 = dma.hbm_to_vmem [thread:$0]  %s822_s0, 256, %s731_s27, [#allocation3], %s687_s13, %s687_s13, %s688_s14  }
  0x23   :  { %s689_s26 = smov [#allocation6]   ;;  %s690_s29 = smov [#allocation7]  }
  0x24   :  { %s46_s28 = sshll.u32 %s689_s26, 4  ;;  %s60_s30 = sshll.u32 %s690_s29, 4  ;;  %s47_s28 = int_to_ptr.vmem [resolvable:$true] %s46_s28  ;;  %s768_s30 = int_to_ptr.vmem [resolvable:$true] %s60_s30 }
  0x25   :  { %s635_s10 = scalar_lea.hbm %s825_s3, 2048 }
  0x26   :  { %p636_p2 = scmp.ne.s32.totalorder %s825_s3, %s635_s10  ;;  %p639_p3 = scmp.lt.u32.totalorder %s635_s10, %s825_s3 }
  0x28   :  { %p641_p4 = pnand %p639_p3, %p636_p2 }
  0x2a   :  { %644 = shalt.err (!%p641_p4)
}
  0x2b   :  { %s645_s0 = scalar_lea.vmem %s47_s28, 2048  ;;  %p650_p6 = scmp.lt.s32.totalorder %s47_s28, %s47_s28 }
  0x2c   :  { %p646_p5 = scmp.ne.s32.totalorder %s47_s28, %s645_s0  ;;  %p651_p7 = scmp.lt.s32.totalorder %s645_s0, %s645_s0 }
  0x2e   :  { %p652_p8 = por %p651_p7, %p650_p6 }
  0x30   :  { %p653_p9 = pnand %p652_p8, %p646_p5 }
  0x32   :  { %656 = shalt.err (!%p653_p9)
}
  0x33   :  { %52 = dma.hbm_to_vmem [thread:$0]  %s825_s3, 2048, %s47_s28, [#allocation5], %s687_s13, %s687_s13, %s688_s14  }
  0x34   :  { %s657_s20 = scalar_lea.hbm %s827_s5, 2048 }
  0x35   :  { %p658_p10 = scmp.ne.s32.totalorder %s827_s5, %s657_s20  ;;  %p661_p11 = scmp.lt.u32.totalorder %s657_s20, %s827_s5 }
  0x37   :  { %p663_p12 = pnand %p661_p11, %p658_p10 }
  0x39   :  { %666 = shalt.err (!%p663_p12)
}
  0x3a   :  { %s667_s1 = scalar_lea.vmem %s768_s30, 2048  ;;  %p672_p0 = scmp.lt.s32.totalorder %s768_s30, %s768_s30 }
  0x3b   :  { %p668_p13 = scmp.ne.s32.totalorder %s768_s30, %s667_s1  ;;  %p673_p1 = scmp.lt.s32.totalorder %s667_s1, %s667_s1 }
  0x3d   :  { %p674_p2 = por %p673_p1, %p672_p0 }
  0x3f   :  { %p675_p3 = pnand %p674_p2, %p668_p13 }
  0x41   :  { %678 = shalt.err (!%p675_p3)
}
  0x42   :  { %66 = dma.hbm_to_vmem [thread:$0]  %s827_s5, 2048, %s768_s30, [#allocation8], %s687_s13, %s687_s13, %s688_s14  }
  0x43   :  { %679 = dma.done.wait [#allocation3], 256  }
  0x44   :  { %680 = vsyncadd [#allocation3], 4294967040 }
  0x45   :  { %681 = dma.done.wait [#allocation5], 2560  }
  0x46   :  { %682 = vsyncadd [#allocation5], 4294964736 }
  0x47   :  { %683 = dma.done.wait [#allocation8], 2048  }
  0x48   :  { %684 = vsyncadd [#allocation8], 4294965248  ;;  %vm94_vm0 = vcmask 261120   ;;  %v83_v0 = vld [vmem:[#allocation4] sm:$0xff]  ;;  %v84_v1 = vld [vmem:[#allocation4 + $0x8] sm:$0xff] }
  0x49   :  { %v85_v2 = vld [vmem:[#allocation4 + $0x10] sm:$0xff]  ;;  %v513_v3 = vpack.c.bf16 %v84_v1, %v83_v0  ;;  %v86_v4 = vld [vmem:[#allocation4 + $0x18] sm:$0xff]  ;;  %v178_v7 = vld [vmem:[#allocation6] sm:$0xff] }
  0x4a   :  { %v81_v5 = vld [vmem:[#allocation2] sm:$0xff]  ;;  %v517_v6 = vpack.c.bf16 %v86_v4, %v85_v2  ;;  %v179_v8 = vld [vmem:[#allocation6 + $0x8] sm:$0xff]  ;;  %v181_v11 = vld [vmem:[#allocation6 + $0x18] sm:$0xff] }
  0x4b   :  { %440 = vmatprep.mubr.msk.f32.mxu0 %vm94_vm0, %v81_v5  ;;  %v180_v9 = vld [vmem:[#allocation6 + $0x10] sm:$0xff]  ;;  %514 = vmatprep.subr.bf16.mxu0 %v513_v3  ;;  %v521_v10 = vpack.c.bf16 %v179_v8, %v178_v7  ;;  %v182_v13 = vld [vmem:[#allocation6 + $0x20] sm:$0xff]  ;;  %v183_v14 = vld [vmem:[#allocation6 + $0x28] sm:$0xff] }
  0x4c   :  { %516 = vmatpush3.bf16.msra.mxu0 %v513_v3  ;;  %v525_v12 = vpack.c.bf16 %v181_v11, %v180_v9  ;;  %v529_v15 = vpack.c.bf16 %v183_v14, %v182_v13  ;;  %v82_v16 = vld [vmem:[#allocation2 + $0x8] sm:$0xff]  ;;  %v184_v17 = vld [vmem:[#allocation6 + $0x30] sm:$0xff]  ;;  %v186_v20 = vld [vmem:[#allocation6 + $0x40] sm:$0xff] }
  0x4d   :  { %518 = vmatprep.subr.bf16.mxu0 %v517_v6  ;;  %522 = vmatprep.subr.bf16.mxu1 %v521_v10  ;;  %v185_v18 = vld [vmem:[#allocation6 + $0x38] sm:$0xff]  ;;  %v187_v21 = vld [vmem:[#allocation6 + $0x48] sm:$0xff]  ;;  %v188_v23 = vld [vmem:[#allocation6 + $0x50] sm:$0xff] }
  0x4e   :  { %524 = vmatpush3.bf16.msra.mxu1 %v521_v10  ;;  %v533_v19 = vpack.c.bf16 %v185_v18, %v184_v17  ;;  %v537_v22 = vpack.c.bf16 %v187_v21, %v186_v20  ;;  %v189_v24 = vld [vmem:[#allocation6 + $0x58] sm:$0xff]  ;;  %v190_v26 = vld [vmem:[#allocation6 + $0x60] sm:$0xff]  ;;  %v191_v27 = vld [vmem:[#allocation6 + $0x68] sm:$0xff] }
  0x4f   :  { %526 = vmatprep.subr.bf16.mxu1 %v525_v12  ;;  %v541_v25 = vpack.c.bf16 %v189_v24, %v188_v23  ;;  %v545_v28 = vpack.c.bf16 %v191_v27, %v190_v26  ;;  %v192_v29 = vld [vmem:[#allocation6 + $0x70] sm:$0xff]  ;;  %v193_v30 = vld [vmem:[#allocation6 + $0x78] sm:$0xff]  ;;  %v278_v32 = vld [vmem:[#allocation7] sm:$0xff] }
  0x50   :  { %520 = vmatpush3.bf16.msra.mxu0 %v517_v6  ;;  %v549_v31 = vpack.c.bf16 %v193_v30, %v192_v29  ;;  %v279_v33 = vld [vmem:[#allocation7 + $0x8] sm:$0xff]  ;;  %v280_v34 = vld [vmem:[#allocation7 + $0x10] sm:$0xff]  ;;  %v281_v36 = vld [vmem:[#allocation7 + $0x18] sm:$0xff] }
  0x51   :  { %v553_v35 = vpack.c.bf16 %v279_v33, %v278_v32  ;;  %v557_v37 = vpack.c.bf16 %v281_v36, %v280_v34  ;;  %v282_v38 = vld [vmem:[#allocation7 + $0x20] sm:$0xff]  ;;  %v283_v39 = vld [vmem:[#allocation7 + $0x28] sm:$0xff]  ;;  %v284_v41 = vld [vmem:[#allocation7 + $0x30] sm:$0xff] }
  0x52   :  { %528 = vmatpush3.bf16.msra.mxu1 %v525_v12  ;;  %v561_v40 = vpack.c.bf16 %v283_v39, %v282_v38  ;;  %v285_v42 = vld [vmem:[#allocation7 + $0x38] sm:$0xff]  ;;  %v286_v44 = vld [vmem:[#allocation7 + $0x40] sm:$0xff]  ;;  %v287_v45 = vld [vmem:[#allocation7 + $0x48] sm:$0xff] }
  0x53   :  { %441 = vmatmul.mubr.msk.f32.vlgmr.msra.gmra.mrb[0].mxu0 %vm94_vm0, %v82_v16  ;;  %530 = vmatprep.subr.bf16.mxu1 %v529_v15  ;;  %v565_v43 = vpack.c.bf16 %v285_v42, %v284_v41  ;;  %v569_v46 = vpack.c.bf16 %v287_v45, %v286_v44  ;;  %v288_v47 = vld [vmem:[#allocation7 + $0x50] sm:$0xff]  ;;  %v289_v48 = vld [vmem:[#allocation7 + $0x58] sm:$0xff]  ;;  %v290_v50 = vld [vmem:[#allocation7 + $0x60] sm:$0xff] }
  0x54   :  { %554 = vmatprep.subr.bf16.mxu0 %v553_v35  ;;  %v573_v49 = vpack.c.bf16 %v289_v48, %v288_v47  ;;  %v291_v51 = vld [vmem:[#allocation7 + $0x68] sm:$0xff]  ;;  %v385_v53 = vld [vmem:[%s824_s2] ss:$0 sm:$0xff]  ;;  %v293_v61 = vld [vmem:[#allocation7 + $0x78] sm:$0xff] }
  0x55   :  { %556 = vmatpush3.bf16.msra.mxu0 %v553_v35  ;;  %v577_v52 = vpack.c.bf16 %v291_v51, %v290_v50  ;;  %v292_v60 = vld [vmem:[#allocation7 + $0x70] sm:$0xff] }
  0x56   :  { %532 = vmatpush3.bf16.msra.mxu1 %v529_v15  ;;  %558 = vmatprep.subr.bf16.mxu0 %v557_v37  ;;  %v581_v62 = vpack.c.bf16 %v293_v61, %v292_v60  ;;  %v388_v63 = vld [vmem:[%s826_s4] ss:$0 sm:$0xff] }
  0x57   :  { %534 = vmatprep.subr.bf16.mxu1 %v533_v19  ;;  %v389_v6 = vld [vmem:[%s828_s6] ss:$0 sm:$0xff] }
  0x59   :  { %560 = vmatpush3.bf16.msra.mxu0 %v557_v37 }
  0x5a   :  { %536 = vmatpush3.bf16.msra.mxu1 %v533_v19  ;;  %562 = vmatprep.subr.bf16.mxu0 %v561_v40 }
  0x5b   :  { %538 = vmatprep.subr.bf16.mxu1 %v537_v22 }
  0x5d   :  { %564 = vmatpush3.bf16.msra.mxu0 %v561_v40 }
  0x5e   :  { %540 = vmatpush3.bf16.msra.mxu1 %v537_v22  ;;  %566 = vmatprep.subr.bf16.mxu0 %v565_v43 }
  0x5f   :  { %542 = vmatprep.subr.bf16.mxu1 %v541_v25 }
  0x61   :  { %568 = vmatpush3.bf16.msra.mxu0 %v565_v43 }
  0x62   :  { %544 = vmatpush3.bf16.msra.mxu1 %v541_v25  ;;  %570 = vmatprep.subr.bf16.mxu0 %v569_v46 }
  0x63   :  { %546 = vmatprep.subr.bf16.mxu1 %v545_v28 }
  0x65   :  { %572 = vmatpush3.bf16.msra.mxu0 %v569_v46 }
  0x66   :  { %548 = vmatpush3.bf16.msra.mxu1 %v545_v28  ;;  %574 = vmatprep.subr.bf16.mxu0 %v573_v49 }
  0x67   :  { %550 = vmatprep.subr.bf16.mxu1 %v549_v31 }
  0x69   :  { %576 = vmatpush3.bf16.msra.mxu0 %v573_v49 }
  0x6a   :  { %552 = vmatpush3.bf16.msra.mxu1 %v549_v31  ;;  %578 = vmatprep.subr.bf16.mxu0 %v577_v52 }
  0x6d   :  { %580 = vmatpush3.bf16.msra.mxu0 %v577_v52 }
  0x6e   :  { %582 = vmatprep.subr.bf16.mxu0 %v581_v62 }
  0x71   :  { %584 = vmatpush3.bf16.msra.mxu0 %v581_v62 }
 0x126   :  { %v442_v54 = vpop.f32.mrb[0].mxu0 }
 0x127   :  { %v173_v55 = vadd.f32 %v442_v54, %v385_v53  ;;  %v167_v56 = vpop.f32.mrb[1].mxu0 }
 0x128   :  { %v168_v57 = vadd.f32 %v385_v53, %v167_v56 }
 0x129   :  { %v177_v59 = vmax.f32 %v173_v55, 0.0 }
 0x12a   :  { %v176_v58 = vmax.f32 %v168_v57, 0.0 }
 0x12c   :  { %475 = vmatprep.mubr.f32.mxu1 %v176_v58 }
 0x12d   :  { %476 = vmatmul.mubr.f32.vlgmr.msra.gmra.mrb[0].mxu1 %v177_v59 }
 0x200   :  { %v477_v0 = vpop.f32.mrb[0].mxu1 }
 0x201   :  { %v273_v1 = vadd.f32 %v477_v0, %v388_v63  ;;  %v267_v2 = vpop.f32.mrb[1].mxu1 }
 0x202   :  { %v268_v3 = vadd.f32 %v388_v63, %v267_v2 }
 0x203   :  { %v277_v5 = vmax.f32 %v273_v1, 0.0 }
 0x204   :  { %v276_v4 = vmax.f32 %v268_v3, 0.0 }
 0x206   :  { %510 = vmatprep.mubr.f32.mxu0 %v276_v4 }
 0x207   :  { %511 = vmatmul.mubr.f32.vlgmr.msra.gmra.mrb[2].mxu0 %v277_v5 }
 0x2da   :  { %v512_v7 = vpop.f32.mrb[2].mxu0 }
 0x2db   :  { %v373_v8 = vadd.f32 %v512_v7, %v389_v6  ;;  %v367_v9 = vpop.f32.mrb[3].mxu0 }
 0x2dc   :  { %v368_v10 = vadd.f32 %v389_v6, %v367_v9 }
 0x2dd   :  { %377 = vst [vmem:[%s829_s7 + $0x8] sm:$0xff] %v373_v8 }
 0x2de   :  { %376 = vst [vmem:[%s829_s7] sm:$0xff] %v368_v10 }
 0x2df   :  { %382 = vsyncpa [#allocation3], 1 }
 0x2e0   :  { %383 = vsyncpa [#allocation5], 1 }
 0x2e1   :  { %384 = vsyncpa [#allocation8], 1 }

</bundles_post_ra>
